<compile_context>
chip_gen: v7x
topology: tpu7x:2x2x1
jax: 0.10.0
libtpu: 0.0.40
codegen_flags: <defaults>
</compile_context>

<pallas_src>
import math

import jax
import jax.numpy as jnp
from jax.experimental import pallas as pl
from jax.experimental.pallas import tpu as pltpu


# ----------------------------------------------------------------------------
# Kernels
# ----------------------------------------------------------------------------

def _row_softmax_f32(adj_ref):
    """Numerically stable row-wise softmax of the current adj tile, in f32."""
    adj = adj_ref[...].astype(jnp.float32)
    row_max = jnp.max(adj, axis=-1, keepdims=True)
    e = jnp.exp(adj - row_max)
    # EUP approximate reciprocal for the denominator (separate bundle slot).
    inv_denom = pl.reciprocal(jnp.sum(e, axis=-1, keepdims=True), approx=True)
    return e * inv_denom


def gam_layer1_kernel(adj_ref, hw1_ref, b1_ref, w2_ref, p2_ref, alpha_ref):
    # alpha = softmax(adj)  (materialized once in bf16, reused by pass C)
    # P2    = relu(alpha @ HW1 + b1) @ W2          (one row block)
    # TODO(synk): nn.Dropout is identity at inference time; not applied.
    alpha = _row_softmax_f32(adj_ref).astype(jnp.bfloat16)          # (TM, N)
    alpha_ref[...] = alpha
    ah = jnp.dot(alpha, hw1_ref[...],
                 preferred_element_type=jnp.float32)                # (TM, NHID_P)
    o1 = jnp.maximum(ah + b1_ref[...], 0.0)                         # f32 bias+relu
    p2_ref[...] = jnp.dot(o1.astype(jnp.bfloat16), w2_ref[...],
                          preferred_element_type=jnp.float32).astype(p2_ref.dtype)


def gam_layer2_kernel(alpha_ref, p2_ref, b2_ref, out_ref):
    # out = relu(alpha @ P2 + b2)   — alpha arrives pre-softmaxed (bf16) from
    # pass B, so no N^2 softmax recompute here.
    ao = jnp.dot(alpha_ref[...], p2_ref[...],
                 preferred_element_type=jnp.float32)
    out_ref[...] = jnp.maximum(ao + b2_ref[...], 0.0).astype(out_ref.dtype)


# ----------------------------------------------------------------------------
# Wrapper
# ----------------------------------------------------------------------------

def _round_up(x: int, m: int) -> int:
    return ((x + m - 1) // m) * m


def _vmem_capacity_bytes() -> int:
    # v7x has 64 MiB of VMEM per TensorCore (half of v5e/v6e), so the
    # conservative fallback assumes 64 MiB.
    try:
        cap = getattr(pltpu.get_tpu_info(), "vmem_capacity_bytes", None)
        if cap:
            return int(cap)
    except Exception:
        pass
    return 64 * 1024 * 1024


def _min_grid_steps(n_rows: int) -> int:
    # >= 2 grid steps keep both v7x TensorCores busy under
    # dimension_semantics=("parallel",); harmless on single-TC v5e/v6e.
    if n_rows >= 2048:
        return 4
    if n_rows >= 128:
        return 2
    return 1


def _pick_block_rows(n_rows, io_bytes_per_row, tmp_bytes_per_row,
                     resident_bytes, budget_bytes):
    """Largest row tile whose pipeline + in-kernel temporaries fit the budget."""
    cap = max(16, _round_up(n_rows, 16))
    steps = _min_grid_steps(n_rows)
    if steps > 1:
        cap = min(cap, max(16, _round_up(pl.cdiv(n_rows, steps), 16)))
    for bm in (1024, 512, 256, 128, 64, 32, 16):
        if bm > cap:
            continue
        # double-buffered DMA tiles + single-buffered in-kernel temporaries
        # + resident (constant index_map) blocks (counted double-buffered, the
        # conservative assumption for the BlockSpec pipeline).
        need = bm * (2 * io_bytes_per_row + tmp_bytes_per_row) + resident_bytes
        if need <= budget_bytes:
            return bm
    return 16


def gam_forward(hidden, adj, w1, b1, w2, b2, *, block_rows=None):
    n = adj.shape[0]
    nhid = w1.shape[1]
    nout = w2.shape[1]
    nhid_p = _round_up(nhid, 128)   # pad to exactly 128 — no extra columns;
    nout_p = _round_up(nout, 128)   # the MXU-fill lever is a deep M tile.
    f32, bf16 = jnp.float32, jnp.bfloat16

    # Lane-dense (multiple-of-128) zero-padded parameters; padded columns stay
    # exactly zero through bias-add + relu and are sliced off at the end.
    w1p = jnp.pad(w1.astype(bf16), ((0, 0), (0, nhid_p - nhid)))
    b1p = jnp.pad(b1.astype(f32), ((0, 0), (0, nhid_p - nhid)))
    w2p = jnp.pad(w2.astype(bf16), ((0, nhid_p - nhid), (0, nout_p - nout)))
    b2p = jnp.pad(b2.astype(f32), ((0, 0), (0, nout_p - nout)))

    # HW1 = hidden @ W1 is tiny; plain XLA handles it fine (saves a kernel
    # launch, a pipeline setup, and one tuning surface).
    hw1 = jnp.dot(hidden.astype(bf16), w1p,
                  preferred_element_type=f32).astype(bf16)          # (n, nhid_p)

    capacity = _vmem_capacity_bytes()
    vmem_limit = int(capacity * 0.90)
    buf_budget = int(vmem_limit * 0.85)   # ~15% headroom for compiler scratch
    cparams = pltpu.CompilerParams(
        dimension_semantics=("parallel",),  # shard row blocks across v7x's 2 TCs
        vmem_limit_bytes=vmem_limit,
    )

    # ---- pass B: alpha = softmax(adj);  P2 = relu(alpha @ HW1 + b1) @ W2 ----
    resident_b = 2 * (hw1.size * 2 + b1p.size * 4 + w2p.size * 2)
    bm_b = block_rows or _pick_block_rows(
        n,
        io_bytes_per_row=n * 4 + n * 2 + nout_p * 2,   # adj in; alpha + P2 out
        tmp_bytes_per_row=3 * n * 4 + 10 * nhid_p,     # f32 softmax temps + ah/o1
        resident_bytes=resident_b, budget_bytes=buf_budget)
    p2, alpha = pl.pallas_call(
        gam_layer1_kernel,
        out_shape=(jax.ShapeDtypeStruct((n, nout_p), bf16),   # P2
                   jax.ShapeDtypeStruct((n, n), bf16)),        # alpha
        grid=(pl.cdiv(n, bm_b),),
        in_specs=[
            pl.BlockSpec((bm_b, n), lambda i: (i, 0)),           # adj rows (tiled)
            pl.BlockSpec((n, nhid_p), lambda i: (0, 0)),         # HW1 (resident)
            pl.BlockSpec((1, nhid_p), lambda i: (0, 0)),         # b1
            pl.BlockSpec((nhid_p, nout_p), lambda i: (0, 0)),    # W2
        ],
        out_specs=(pl.BlockSpec((bm_b, nout_p), lambda i: (i, 0)),
                   pl.BlockSpec((bm_b, n), lambda i: (i, 0))),
        compiler_params=cparams,
    )(adj, hw1, b1p, w2p)

    # ---- pass C: out = relu(alpha @ P2 + b2) --------------------------------
    resident_c = 2 * (p2.size * 2 + b2p.size * 4)
    bm_c = block_rows or _pick_block_rows(
        n,
        io_bytes_per_row=n * 2 + nout_p * 4,           # bf16 alpha in, f32 out
        tmp_bytes_per_row=6 * nout_p,                  # f32 matmul result + cast
        resident_bytes=resident_c, budget_bytes=buf_budget)
    out = pl.pallas_call(
        gam_layer2_kernel,
        out_shape=jax.ShapeDtypeStruct((n, nout_p), f32),
        grid=(pl.cdiv(n, bm_c),),
        in_specs=[
            pl.BlockSpec((bm_c, n), lambda i: (i, 0)),           # alpha rows (bf16)
            pl.BlockSpec((n, nout_p), lambda i: (0, 0)),         # P2 (resident)
            pl.BlockSpec((1, nout_p), lambda i: (0, 0)),         # b2
        ],
        out_specs=pl.BlockSpec((bm_c, nout_p), lambda i: (i, 0)),
        compiler_params=cparams,
    )(alpha, p2, b2p)

    return out[:, :nout]


# ----------------------------------------------------------------------------
# Demo / self-check
# ----------------------------------------------------------------------------

def xavier_uniform(key, shape, gain):
    fan_in, fan_out = shape[0], shape[1]
    bound = gain * math.sqrt(6.0 / (fan_in + fan_out))
    return jax.random.uniform(key, shape, jnp.float32, minval=-bound, maxval=bound)


if __name__ == "__main__":
    # Small, module-consistent shapes.
    N, NIN, NHID, NOUT = 256, 64, 32, 16
    gain = math.sqrt(2.0)

    key = jax.random.PRNGKey(0)
    k_h, k_a, k_w1, k_b1, k_w2, k_b2 = jax.random.split(key, 6)

    hidden = jax.random.normal(k_h, (N, NIN), jnp.float32)
    adj = jax.random.normal(k_a, (N, N), jnp.float32)

    # Deterministic parameter init matching nn.init.xavier_uniform_(gain=sqrt(2)).
    W1 = xavier_uniform(k_w1, (NIN, NHID), gain)
    b1 = xavier_uniform(k_b1, (1, NHID), gain)
    W2 = xavier_uniform(k_w2, (NHID, NOUT), gain)
    b2 = xavier_uniform(k_b2, (1, NOUT), gain)

    # Auto-picked (VMEM-sized, >=2 grid steps) row tile.
    out = gam_forward(hidden, adj, W1, b1, W2, b2)
    jax.block_until_ready(out)

    # Explicit multi-block tiling path (grid of 4 row blocks).
    out_tiled = gam_forward(hidden, adj, W1, b1, W2, b2, block_rows=64)
    jax.block_until_ready(out_tiled)

    # Pure-JAX f32 reference of the same math (kernel uses bf16 MXU operands
    # and an approx softmax reciprocal, so tolerances are set accordingly).
    alpha_ref = jax.nn.softmax(adj, axis=1)
    ref = jnp.maximum(alpha_ref @ hidden @ W1 + b1, 0.0)
    ref = jnp.maximum(alpha_ref @ ref @ W2 + b2, 0.0)

    assert out.shape == (N, NOUT)
    assert jnp.allclose(out, ref, atol=5e-2, rtol=5e-2), \
        f"max abs diff {float(jnp.max(jnp.abs(out - ref)))}"
    assert jnp.allclose(out_tiled, ref, atol=5e-2, rtol=5e-2), \
        f"max abs diff {float(jnp.max(jnp.abs(out_tiled - ref)))}"

    print("KERNEL_OK")
</pallas_src>

<mosaic_0001>
module attributes {stable_mosaic.version = 11 : i64} {
  func.func @gam_layer1_kernel(%arg0: i32, %arg1: memref<128x256xf32, #tpu.memory_space<vmem>>, %arg2: memref<256x128xbf16, #tpu.memory_space<vmem>>, %arg3: memref<1x128xf32, #tpu.memory_space<vmem>>, %arg4: memref<128x128xbf16, #tpu.memory_space<vmem>>, %arg5: memref<128x128xbf16, #tpu.memory_space<vmem>>, %arg6: memref<128x256xbf16, #tpu.memory_space<vmem>>) attributes {dimension_semantics = [#tpu.dimension_semantics<parallel>], iteration_bounds = array<i64: 2>, scalar_prefetch = 0 : i64, scratch_operands = 0 : i64, tpu.core_type = #tpu.core_type<tc>, window_params = [{transform_indices = @transform_0, window_bounds = array<i64: 128, 256>}, {pipeline_mode = #tpu.pipeline_mode<synchronous>, transform_indices = @transform_1, window_bounds = array<i64: 256, 128>}, {pipeline_mode = #tpu.pipeline_mode<synchronous>, transform_indices = @transform_2, window_bounds = array<i64: 1, 128>}, {pipeline_mode = #tpu.pipeline_mode<synchronous>, transform_indices = @transform_3, window_bounds = array<i64: 128, 128>}, {transform_indices = @transform_4, window_bounds = array<i64: 128, 128>}, {transform_indices = @transform_5, window_bounds = array<i64: 128, 256>}]} {
    %c0 = arith.constant 0 : index
    %c0_0 = arith.constant 0 : index
    %0 = vector.load %arg1[%c0, %c0_0] : memref<128x256xf32, #tpu.memory_space<vmem>>, vector<128x256xf32>
    %cst = arith.constant dense<0xFF800000> : vector<128xf32>
    %1 = vector.multi_reduction <maximumf>, %0, %cst [1] : vector<128x256xf32> to vector<128xf32>
    %2 = vector.shape_cast %1 : vector<128xf32> to vector<128x1xf32>
    %3 = vector.broadcast %2 : vector<128x1xf32> to vector<128x256xf32>
    %4 = arith.subf %0, %3 : vector<128x256xf32>
    %5 = math.exp %4 : vector<128x256xf32>
    %cst_1 = arith.constant dense<0.000000e+00> : vector<128xf32>
    %6 = vector.multi_reduction <add>, %5, %cst_1 [1] : vector<128x256xf32> to vector<128xf32>
    %7 = vector.shape_cast %6 : vector<128xf32> to vector<128x1xf32>
    %8 = tpu.reciprocal %7 {approx = true} : vector<128x1xf32> -> vector<128x1xf32>
    %9 = vector.broadcast %8 : vector<128x1xf32> to vector<128x256xf32>
    %10 = arith.mulf %5, %9 : vector<128x256xf32>
    %11 = arith.truncf %10 : vector<128x256xf32> to vector<128x256xbf16>
    %c0_2 = arith.constant 0 : index
    %c0_3 = arith.constant 0 : index
    %12 = vector.load %arg6[%c0_2, %c0_3] : memref<128x256xbf16, #tpu.memory_space<vmem>>, vector<128x256xbf16>
    tpu.vector_store %arg6[%c0_2, %c0_3], %11 {strides = array<i32>} : memref<128x256xbf16, #tpu.memory_space<vmem>>, vector<128x256xbf16>,
    %c0_4 = arith.constant 0 : index
    %c0_5 = arith.constant 0 : index
    %13 = vector.load %arg2[%c0_4, %c0_5] : memref<256x128xbf16, #tpu.memory_space<vmem>>, vector<256x128xbf16>
    %cst_6 = arith.constant dense<0.000000e+00> : vector<128x128xf32>
    %14 = tpu.matmul %11, %13, %cst_6 {dimension_numbers = #tpu.dot_dimension_numbers<[1], [0], [0], [1], [0, 0, 1, 1], [], []>} : vector<128x256xbf16>, vector<256x128xbf16>, vector<128x128xf32> -> vector<128x128xf32>
    %c0_7 = arith.constant 0 : index
    %c0_8 = arith.constant 0 : index
    %15 = vector.load %arg3[%c0_7, %c0_8] : memref<1x128xf32, #tpu.memory_space<vmem>>, vector<1x128xf32>
    %16 = vector.broadcast %15 : vector<1x128xf32> to vector<128x128xf32>
    %17 = arith.addf %14, %16 : vector<128x128xf32>
    %cst_9 = arith.constant 0.000000e+00 : f32
    %18 = vector.broadcast %cst_9 : f32 to vector<128x128xf32>
    %19 = arith.maximumf %17, %18 : vector<128x128xf32>
    %20 = arith.truncf %19 : vector<128x128xf32> to vector<128x128xbf16>
    %c0_10 = arith.constant 0 : index
    %c0_11 = arith.constant 0 : index
    %21 = vector.load %arg4[%c0_10, %c0_11] : memref<128x128xbf16, #tpu.memory_space<vmem>>, vector<128x128xbf16>
    %cst_12 = arith.constant dense<0.000000e+00> : vector<128x128xf32>
    %22 = tpu.matmul %20, %21, %cst_12 {dimension_numbers = #tpu.dot_dimension_numbers<[1], [0], [0], [1], [0, 0, 1, 1], [], []>} : vector<128x128xbf16>, vector<128x128xbf16>, vector<128x128xf32> -> vector<128x128xf32>
    %23 = arith.truncf %22 : vector<128x128xf32> to vector<128x128xbf16>
    %c0_13 = arith.constant 0 : index
    %c0_14 = arith.constant 0 : index
    %24 = vector.load %arg5[%c0_13, %c0_14] : memref<128x128xbf16, #tpu.memory_space<vmem>>, vector<128x128xbf16>
    tpu.vector_store %arg5[%c0_13, %c0_14], %23 {strides = array<i32>} : memref<128x128xbf16, #tpu.memory_space<vmem>>, vector<128x128xbf16>,
    return
  }
  func.func @transform_0(%arg0: i32) -> (i32, i32) {
    %c0_i32 = arith.constant 0 : i32
    %c0_i32_0 = arith.constant 0 : i32
    return %arg0, %c0_i32 : i32, i32
  }
  func.func @transform_1(%arg0: i32) -> (i32, i32) {
    %c0_i32 = arith.constant 0 : i32
    %c0_i32_0 = arith.constant 0 : i32
    %c0_i32_1 = arith.constant 0 : i32
    return %c0_i32, %c0_i32_0 : i32, i32
  }
  func.func @transform_2(%arg0: i32) -> (i32, i32) {
    %c0_i32 = arith.constant 0 : i32
    %c0_i32_0 = arith.constant 0 : i32
    %c0_i32_1 = arith.constant 0 : i32
    return %c0_i32, %c0_i32_0 : i32, i32
  }
  func.func @transform_3(%arg0: i32) -> (i32, i32) {
    %c0_i32 = arith.constant 0 : i32
    %c0_i32_0 = arith.constant 0 : i32
    %c0_i32_1 = arith.constant 0 : i32
    return %c0_i32, %c0_i32_0 : i32, i32
  }
  func.func @transform_4(%arg0: i32) -> (i32, i32) {
    %c0_i32 = arith.constant 0 : i32
    %c0_i32_0 = arith.constant 0 : i32
    return %arg0, %c0_i32 : i32, i32
  }
  func.func @transform_5(%arg0: i32) -> (i32, i32) {
    %c0_i32 = arith.constant 0 : i32
    %c0_i32_0 = arith.constant 0 : i32
    return %arg0, %c0_i32 : i32, i32
  }
}

</mosaic_0001>

<bundles_post_ra>
// kernel: tpu_custom_call.1
= control target key start
LH: loop header
LB: loop body
LE: loop exit
PB: predicated region body
PF: predicated region fallthrough
CT: control target
= control target key end

     0   :  { %11 = vsyncpa [#allocation3], 0  ;;  %s2641_s0 = inlined_call_operand.hbm [shape: f32[256,256], index: 0, kind: input, shape index: {}]   ;;  %s2642_s1 = inlined_call_operand.hbm [shape: bf16[256,128], index: 1, kind: input, shape index: {}]   ;;  %s2643_s2 = inlined_call_operand.vmem [shape: f32[1,128], index: 2, kind: input, shape index: {}]   ;;  %s2644_s3 = inlined_call_operand.hbm [shape: bf16[128,128], index: 3, kind: input, shape index: {}]   ;;  %s2645_s4 = inlined_call_operand.hbm [shape: bf16[256,128], index: 4, kind: output, shape index: {0}]   ;;  %s2646_s5 = inlined_call_operand.hbm [shape: bf16[256,256], index: 5, kind: output, shape index: {1}]  }
   0x1   :  { %13 = vsyncpa [#allocation3 + $0x1], 0 }
   0x2   :  { %14 = vsyncpa [#allocation6], 0 }
   0x3   :  { %15 = vsyncpa [#allocation4], 0 }
   0x4   :  { %17 = vsyncpa [#allocation4 + $0x1], 0 }
   0x5   :  { %18 = vsyncpa [#allocation10], 0 }
   0x6   :  { %20 = vsyncpa [#allocation10 + $0x1], 0  ;;  %s2039_s18 = smov 0   ;;  %s2041_s19 = smov 0  }
   0x7   :  { %s2043_s20 = smov 0   ;;  %s2045_s21 = smov 0  }
   0x8 LB: > { %s2060_s22 = sadd.s32 4294967295, %s1994_s21   ;;  %s1329_s23 = sadd.s32 4294967294, %s1994_s21   ;;  %s1994_s21 = sphi %s2045_s21, %s2666_s21   ;;  %s1990_s20 = sphi %s2043_s20, %s2665_s20   ;;  %s1986_s19 = sphi %s2041_s19, %s2664_s19   ;;  %s1982_s18 = sphi %s2039_s18, %s2663_s18  }
   0x9   : > { %p46_p0 = scmp.ne.s32.totalorder %s1986_s19, %s1982_s18  ;;  %p2647_p1 = scmp.eq.s32.totalorder %s2060_s22, 0 }
   0xa   : > { %p139_p3 = scmp.eq.s32.totalorder %s1329_s23, 1  ;;  %p1330_p5 = scmp.ge.s32.totalorder %s1994_s21, 1 }
   0xb   : > { %p2069_p4 = por %p2647_p1, %p46_p0  ;;  %p172_p7 = scmp.lt.s32.totalorder %s1994_s21, 3 }
   0xc   : > { %p2074_p6 = por %p139_p3, %p46_p0  ;;  %s1996_s27 = smov [#allocation5]  }
   0xd   : > { %s2650_s24 = scalar_select %p2069_p4, 1, 0 }
   0xe   : > { %s2651_s25 = scalar_select %p2074_p6, 1, 0 }
   0xf   : > { %p2079_p8 = pnand %p1330_p5, %p172_p7  ;;  %s184_s28 = sshll.u32 %s1996_s27, 4  ;;  %s2083_s28 = int_to_ptr.vmem [resolvable:$true] %s184_s28 }
  0x10   : > { %s1997_s30 = smov [#allocation7]   ;;  %s1806_s9 = scalar_lea.hbm %s2642_s1, 2048 }
  0x11   : > { %p1620_p9 = pneg %p2079_p8  ;;  %s200_s6 = sshll.u32 %s1997_s30, 4  ;;  %s2094_s6 = int_to_ptr.vmem [resolvable:$true] %s200_s6 }
  0x12   : > { %p1807_p12 = scmp.ne.s32.totalorder %s2642_s1, %s1806_s9  ;;  %p1813_p5 = scmp.lt.u32.totalorder %s1806_s9, %s2642_s1 }
  0x13   : > { %p2090_p11 = pnand %p1620_p9, %p2647_p1 }
  0x15   : > { %p1808_p13 = pneg %p2090_p11 }
  0x17   : > { %p1809_p0 = pnand %p1808_p13, %p1807_p12 }
  0x19   : > { %p1810_p3 = pneg %p1809_p0 }
  0x1b   : > { %p1815_p7 = pnand %p1813_p5, %p1810_p3 }
  0x1d   : > { %1818 = shalt.err (!%p1815_p7)
}
  0x1e   : > { %s1819_s14 = scalar_lea.vmem %s2083_s28, 2048  ;;  %p1827_p2 = scmp.lt.s32.totalorder %s2083_s28, %s2083_s28 }
  0x1f   : > { %p1820_p9 = scmp.ne.s32.totalorder %s2083_s28, %s1819_s14  ;;  %p1828_p12 = scmp.lt.s32.totalorder %s1819_s14, %s1819_s14 }
  0x21   : > { %p1822_p10 = pnand %p1820_p9, %p1808_p13  ;;  %p1829_p0 = por %p1828_p12, %p1827_p2 }
  0x23   : > { %p1823_p1 = pneg %p1822_p10 }
  0x25   : > { %p1830_p6 = pnand %p1829_p0, %p1823_p1 }
  0x27   : > { %1833 = shalt.err (!%p1830_p6)
}
  0x28   : > { %s1998_s15 = smov 64   ;;  %s1999_s16 = smov 4  }
  0x29   : > { %1623 = dma.hbm_to_vmem [thread:$0]  (!%p2090_p11), %s2642_s1, 2048, %s2083_s28, [#allocation6], %s1998_s15, %s1998_s15, %s1999_s16  }
  0x2a   : > { %s1834_s7 = scalar_lea.hbm %s2644_s3, 1024 }
  0x2b   : > { %p1835_p2 = scmp.ne.s32.totalorder %s2644_s3, %s1834_s7  ;;  %p1841_p10 = scmp.lt.u32.totalorder %s1834_s7, %s2644_s3 }
  0x2d   : > { %p1837_p1 = pnand %p1835_p2, %p1808_p13 }
  0x2f   : > { %p1838_p6 = pneg %p1837_p1 }
  0x31   : > { %p1843_p3 = pnand %p1841_p10, %p1838_p6 }
  0x33   : > { %1846 = shalt.err (!%p1843_p3)
}
  0x34   : > { %s1847_s28 = scalar_lea.vmem %s2094_s6, 1024  ;;  %p1855_p12 = scmp.lt.s32.totalorder %s2094_s6, %s2094_s6 }
  0x35   : > { %p1848_p5 = scmp.ne.s32.totalorder %s2094_s6, %s1847_s28  ;;  %p1856_p0 = scmp.lt.s32.totalorder %s1847_s28, %s1847_s28 }
  0x37   : > { %p1850_p7 = pnand %p1848_p5, %p1808_p13  ;;  %p1857_p2 = por %p1856_p0, %p1855_p12 }
  0x39   : > { %p1851_p9 = pneg %p1850_p7 }
  0x3b   : > { %p1858_p1 = pnand %p1857_p2, %p1851_p9 }
  0x3d   : > { %1861 = shalt.err (!%p1858_p1)
}
  0x3e   : > { %1626 = dma.hbm_to_vmem [thread:$0]  (!%p2090_p11), %s2644_s3, 1024, %s2094_s6, [#allocation6], %s1998_s15, %s1998_s15, %s1999_s16  }
  0x3f   : > { %s2149_s14 = sadd.s32 1, %s1994_s21   ;;  %s33_s29 = sadd.s32 1, %s1990_s20 }
  0x40   : > { %s30_s17 = ssub.s32 %s1994_s21, %s2149_s14  ;;  %p40_p13 = scmp.ne.s32.totalorder %s1990_s20, %s1986_s19 }
  0x41   : > { %p31_p6 = scmp.eq.s32.totalorder %s30_s17, 0  ;;  %p41_p10 = scmp.eq.s32.totalorder %s1994_s21, 0 }
  0x42   : > { %p2654_p3 = scmp.eq.s32.totalorder %s2060_s22, 1  ;;  %p1640_p7 = scmp.lt.s32.totalorder %s1994_s21, 2 }
  0x43   : > { %s2165_s27 = scalar_select %p31_p6, %s1990_s20, %s33_s29  }
  0x44   : > { %p2159_p5 = por %p2654_p3, %p40_p13  ;;  %p42_p9 = por %p41_p10, %p40_p13 }
  0x45   : > { %s214_s30 = sand.u32 1, %s1990_s20   ;;  %s1411_s6 = sshll.u32 %s1994_s21, 12 }
  0x46   : > { %s2655_s23 = scalar_select %p2159_p5, 1, 0 }
  0x47   : > { %s1334_s7 = sshll.u32 %s214_s30, 8  ;;  %s2172_s8 = scalar_lea.hbm %s2641_s0, %s1411_s6 }
  0x48   : > { %s218_s9 = scalar_lea.vmem [#allocation2], %s1334_s7  ;;  %p2176_p11 = pnand %p1640_p7, %p42_p9 }
  0x49   : > { %s226_s10 = sshll.u32 %s218_s9, 4  ;;  %s2180_s28 = scalar_lea.sflag [#allocation3], %s214_s30  ;;  %s2174_s10 = int_to_ptr.vmem [resolvable:$true] %s226_s10 }
  0x4a   : > { %s1862_s12 = scalar_lea.hbm %s2172_s8, 4096  ;;  %p1864_p0 = pneg %p2176_p11 }
  0x4b   : > { %p1863_p12 = scmp.ne.s32.totalorder %s2172_s8, %s1862_s12  ;;  %s1867_s17 = scalar_lea.hbm %s2641_s0, 8192 }
  0x4c   : > { %p1868_p13 = scmp.lt.u32.totalorder %s2172_s8, %s2641_s0  ;;  %p1869_p6 = scmp.lt.u32.totalorder %s1867_s17, %s1862_s12 }
  0x4d   : > { %p1865_p2 = pnand %p1864_p0, %p1863_p12  ;;  %p1871_p3 = scmp.lt.u32.totalorder %s1862_s12, %s2172_s8 }
  0x4e   : > { %p1870_p10 = por %p1869_p6, %p1868_p13 }
  0x4f   : > { %p1866_p1 = pneg %p1865_p2 }
  0x50   : > { %p1872_p7 = por %p1871_p3, %p1870_p10 }
  0x52   : > { %p1873_p9 = pnand %p1872_p7, %p1866_p1 }
  0x54   : > { %1876 = shalt.err (!%p1873_p9)
}
  0x55   : > { %s1877_s30 = scalar_lea.vmem %s2174_s10, 4096  ;;  %s2000_s15 = smov [#allocation2]  }
  0x56   : > { %p1878_p12 = scmp.ne.s32.totalorder %s2174_s10, %s1877_s30  ;;  %s1882_s16 = sshll.u32 %s2000_s15, 4  ;;  %s1883_s16 = int_to_ptr.vmem [resolvable:$false] %s1882_s16 }
  0x57   : > { %s1884_s9 = scalar_lea.vmem %s1883_s16, 8192  ;;  %p1885_p4 = scmp.lt.s32.totalorder %s2174_s10, %s1883_s16 }
  0x58   : > { %p1880_p2 = pnand %p1878_p12, %p1864_p0  ;;  %p1886_p13 = scmp.lt.s32.totalorder %s1884_s9, %s1877_s30 }
  0x5a   : > { %p1881_p5 = pneg %p1880_p2  ;;  %p1887_p6 = por %p1886_p13, %p1885_p4 }
  0x5c   : > { %p1888_p10 = pnand %p1887_p6, %p1881_p5 }
  0x5e   : > { %1891 = shalt.err (!%p1888_p10)
}
  0x5f   : > { %s2001_s12 = smov 256   ;;  %s2002_s13 = smov 16  }
  0x60   : > { %1630 = dma.hbm_to_vmem [thread:$0]  (!%p2176_p11), %s2172_s8, 4096, %s2174_s10, %s2180_s28, %s2001_s12, %s2001_s12, %s2002_s13  }
  0x61   : > { %238 = sbr.rel (%p2079_p8) target bundleno = 944 (0x3b0), region = 36  ;;  %s2211_s29 = sand.u32 (!%p2079_p8), 1, %s1986_s19  }
  0x62   : > { %s1339_s17 = sshll.u32 (!%p2079_p8), %s2211_s29, 8  ;;  %s241_s7 = scalar_lea.sflag (!%p2079_p8), [#allocation3], %s2211_s29 }
  0x63   : > { %s2215_s6 = scalar_lea.vmem (!%p2079_p8), [#allocation2], %s1339_s17  ;;  %p2657_p4 = scmp.ne.s32.totalorder (!%p2079_p8), %s2650_s24, 0 }
  0x68   : > { %1965 = dma.done.wait (%p2657_p4), %s241_s7, 4096  }
  0x69   : > { %1967 = vsyncadd (%p2657_p4), %s241_s7, 4294963200  ;;  %p2658_p5 = scmp.eq.s32.totalorder %s2060_s22, 0 }
  0x6b   : > { %1969 = dma.done.wait (%p2658_p5), [#allocation6], 3072   ;;  %p2659_p8 = pmov %p2658_p5 }
  0x6c   : > { %v2226_v0 = vld [vmem:[%s2215_s6] sm:$0xff]  ;;  %v2229_v1 = vld [vmem:[%s2215_s6 + $0x8] sm:$0xff]  ;;  %v2240_v5 = vld [vmem:[%s2215_s6 + $0x10] sm:$0xff]  ;;  %s1343_s24 = sshll.u32 %s2211_s29, 7  ;;  %s1446_s11 = sshll.u32 %s2060_s22, 11 }
  0x6d   : > { %1971 = vsyncadd (%p2659_p8), [#allocation6], 4294964224  ;;  %v2232_v2 = vld [vmem:[%s2215_s6 + $0x20] sm:$0xff]  ;;  %v320_v3 = vmax.f32 %v2226_v0, %v2229_v1  ;;  %v2237_v4 = vld [vmem:[%s2215_s6 + $0x28] sm:$0xff]  ;;  %s2486_s26 = scalar_lea.vmem [#allocation9], %s1343_s24  ;;  %s2562_s16 = scalar_lea.hbm %s2646_s5, %s1446_s11 }
  0x6e   : > { %v2243_v6 = vld [vmem:[%s2215_s6 + $0x18] sm:$0xff]  ;;  %v326_v7 = vmax.f32 %v2232_v2, %v2237_v4  ;;  %v2248_v8 = vld [vmem:[%s2215_s6 + $0x30] sm:$0xff]  ;;  %v2258_v12 = vld [vmem:[%s2215_s6 + $0x40] sm:$0xff]  ;;  %s1205_s28 = sshll.u32 %s2486_s26, 4  ;;  %s1175_s9 = scalar_lea.sflag [#allocation10], %s2211_s29  ;;  %s2564_s28 = int_to_ptr.vmem [resolvable:$true] %s1205_s28 }
  0x6f   : > { %v2251_v9 = vld [vmem:[%s2215_s6 + $0x38] sm:$0xff]  ;;  %321 = vmax.xlane.f32.xlu0 %v320_v3  ;;  %v323_v10 = vmax.f32 %v2240_v5, %v2243_v6  ;;  %v2261_v13 = vld [vmem:[%s2215_s6 + $0x48] sm:$0xff]  ;;  %v2264_v14 = vld [vmem:[%s2215_s6 + $0x50] sm:$0xff]  ;;  %s1892_s12 = scalar_lea.vmem %s2564_s28, 2048  ;;  %p2660_p0 = scmp.ne.s32.totalorder %s2655_s23, 0 }
  0x70   : > { %327 = vmax.xlane.f32.xlu1 %v326_v7  ;;  %v329_v11 = vmax.f32 %v2248_v8, %v2251_v9  ;;  %v2267_v15 = vld [vmem:[%s2215_s6 + $0x58] sm:$0xff]  ;;  %v332_v16 = vmax.f32 %v2258_v12, %v2261_v13  ;;  %v2274_v18 = vld [vmem:[%s2215_s6 + $0x60] sm:$0xff]  ;;  %v2277_v19 = vld [vmem:[%s2215_s6 + $0x68] sm:$0xff]  ;;  %p1893_p11 = scmp.ne.s32.totalorder %s2564_s28, %s1892_s12  ;;  %s2003_s13 = smov [#allocation9]  }
  0x71   : > { %v335_v17 = vmax.f32 %v2264_v14, %v2267_v15  ;;  %v2280_v20 = vld [vmem:[%s2215_s6 + $0x70] sm:$0xff]  ;;  %v2283_v21 = vld [vmem:[%s2215_s6 + $0x78] sm:$0xff]  ;;  %v2286_v22 = vld [vmem:[%s2215_s6 + $0x80] sm:$0xff]  ;;  %v338_v24 = vmax.f32 %v2274_v18, %v2277_v19  ;;  %s1896_s17 = sshll.u32 %s2003_s13, 4  ;;  %s1897_s17 = int_to_ptr.vmem [resolvable:$false] %s1896_s17 }
  0x72   : > { %v2289_v23 = vld [vmem:[%s2215_s6 + $0x88] sm:$0xff]  ;;  %v2294_v25 = vld [vmem:[%s2215_s6 + $0x90] sm:$0xff]  ;;  %v2297_v26 = vld [vmem:[%s2215_s6 + $0x98] sm:$0xff]  ;;  %v341_v27 = vmax.f32 %v2280_v20, %v2283_v21  ;;  %p1894_p1 = pnand %p1893_p11, %p2660_p0  ;;  %s1898_s7 = scalar_lea.vmem %s1897_s17, 4096 }
  0x73   : > { %324 = vmax.xlane.f32.xlu0 %v323_v10  ;;  %v2302_v28 = vld [vmem:[%s2215_s6 + $0xa0] sm:$0xff]  ;;  %v2305_v29 = vld [vmem:[%s2215_s6 + $0xa8] sm:$0xff]  ;;  %v344_v30 = vmax.f32 %v2286_v22, %v2289_v23  ;;  %v2310_v31 = vld [vmem:[%s2215_s6 + $0xb0] sm:$0xff]  ;;  %v347_v33 = vmax.f32 %v2294_v25, %v2297_v26  ;;  %p1899_p7 = scmp.lt.s32.totalorder %s2564_s28, %s1897_s17  ;;  %p1900_p9 = scmp.lt.s32.totalorder %s1898_s7, %s1892_s12 }
  0x74   : > { %330 = vmax.xlane.f32.xlu1 %v329_v11  ;;  %v2313_v32 = vld [vmem:[%s2215_s6 + $0xb8] sm:$0xff]  ;;  %v2318_v34 = vld [vmem:[%s2215_s6 + $0xc0] sm:$0xff]  ;;  %v2321_v35 = vld [vmem:[%s2215_s6 + $0xc8] sm:$0xff]  ;;  %v350_v36 = vmax.f32 %v2302_v28, %v2305_v29  ;;  %p1895_p3 = pneg %p1894_p1 }
  0x75   : > { %v2326_v37 = vld [vmem:[%s2215_s6 + $0xd0] sm:$0xff]  ;;  %v2329_v38 = vld [vmem:[%s2215_s6 + $0xd8] sm:$0xff]  ;;  %v353_v39 = vmax.f32 %v2310_v31, %v2313_v32  ;;  %v2334_v40 = vld [vmem:[%s2215_s6 + $0xe0] sm:$0xff]  ;;  %v356_v42 = vmax.f32 %v2318_v34, %v2321_v35  ;;  %p1901_p12 = por %p1900_p9, %p1899_p7 }
  0x76   : > { %v2337_v41 = vld [vmem:[%s2215_s6 + $0xe8] sm:$0xff]  ;;  %v2342_v43 = vld [vmem:[%s2215_s6 + $0xf0] sm:$0xff]  ;;  %v2345_v44 = vld [vmem:[%s2215_s6 + $0xf8] sm:$0xff]  ;;  %v359_v45 = vmax.f32 %v2326_v37, %v2329_v38 }
  0x77   : > { %333 = vmax.xlane.f32.xlu0 %v332_v16  ;;  %v362_v46 = vmax.f32 %v2334_v40, %v2337_v41  ;;  %v365_v47 = vmax.f32 %v2342_v43, %v2345_v44  ;;  %v1686_v48 = vld [vmem:[#allocation5 + $0x40] sm:$0xff]   ;;  %v1688_v50 = vld [vmem:[#allocation5 + $0x48] sm:$0xff]   ;;  %v1690_v52 = vld [vmem:[#allocation5 + $0x50] sm:$0xff]   ;;  %p1902_p2 = pnand %p1901_p12, %p1895_p3 }
  0x78   : > { %336 = vmax.xlane.f32.xlu1 %v335_v17  ;;  %v1687_v49 = vld [vmem:[#allocation5] sm:$0xff]   ;;  %1494 = vmatprep.subr.bf16.mxu0 %v1686_v48  ;;  %v1689_v51 = vld [vmem:[#allocation5 + $0x8] sm:$0xff]   ;;  %v1691_v53 = vld [vmem:[#allocation5 + $0x10] sm:$0xff]  }
  0x79   : > { %1495 = vmatpush3.bf16.msra.mxu0 %v1687_v49 }
  0x7a   : > { %1496 = vmatprep.subr.bf16.mxu0 %v1688_v50 }
  0x7b   : > { %339 = vmax.xlane.f32.xlu0 %v338_v24 }
  0x7c   : > { %342 = vmax.xlane.f32.xlu1 %v341_v27 }
  0x7d   : > { %1497 = vmatpush3.bf16.msra.mxu0 %v1689_v51 }
  0x7e   : > { %1498 = vmatprep.subr.bf16.mxu0 %v1690_v52 }
  0x7f   : > { %345 = vmax.xlane.f32.xlu0 %v344_v30 }
  0x80   : > { %348 = vmax.xlane.f32.xlu1 %v347_v33 }
  0x81   : > { %1499 = vmatpush3.bf16.msra.mxu0 %v1691_v53 }
  0x83   : > { %351 = vmax.xlane.f32.xlu0 %v350_v36 }
  0x84   : > { %354 = vmax.xlane.f32.xlu1 %v353_v39 }
  0x87   : > { %357 = vmax.xlane.f32.xlu0 %v356_v42 }
  0x88   : > { %360 = vmax.xlane.f32.xlu1 %v359_v45 }
  0x8b   : > { %363 = vmax.xlane.f32.xlu0 %v362_v46 }
  0x8c   : > { %366 = vmax.xlane.f32.xlu1 %v365_v47 }
  0xfc   : > { %v322_v54 = vpop.xlane.xlu0 %321 }
  0xfd   : > { %v368_v55 = vsub.f32 %v2226_v0, %v322_v54  ;;  %v369_v56 = vsub.f32 %v2229_v1, %v322_v54  ;;  %v328_v57 = vpop.xlane.xlu1 %327 }
  0xfe   : > { %v372_v58 = vsub.f32 %v2232_v2, %v328_v57  ;;  %v373_v59 = vsub.f32 %v2237_v4, %v328_v57 }
  0xff   : > { %v400_v60 = vmul.f32 1.442695, %v368_v55  ;;  %v402_v61 = vmul.f32 1.442695, %v369_v56 }
 0x100   : > { %v408_v62 = vmul.f32 1.442695, %v372_v58  ;;  %v410_v63 = vmul.f32 1.442695, %v373_v59  ;;  %v325_v3 = vpop.xlane.xlu0 %324 }
 0x101   : > { %1710 = vpow2.f32 %v400_v60  ;;  %v370_v7 = vsub.f32 %v2240_v5, %v325_v3  ;;  %v371_v10 = vsub.f32 %v2243_v6, %v325_v3  ;;  %v331_v11 = vpop.xlane.xlu1 %330 }
 0x102   : > { %1712 = vpow2.f32 %v402_v61  ;;  %v374_v0 = vsub.f32 %v2248_v8, %v331_v11  ;;  %v375_v1 = vsub.f32 %v2251_v9, %v331_v11 }
 0x103   : > { %1714 = vpow2.f32 %v408_v62  ;;  %v404_v2 = vmul.f32 1.442695, %v370_v7  ;;  %v406_v16 = vmul.f32 1.442695, %v371_v10 }
 0x104   : > { %1716 = vpow2.f32 %v410_v63  ;;  %v412_v4 = vmul.f32 1.442695, %v374_v0  ;;  %v414_v17 = vmul.f32 1.442695, %v375_v1  ;;  %v334_v24 = vpop.xlane.xlu0 %333 }
 0x105   : > { %1718 = vpow2.f32 %v404_v2  ;;  %v376_v27 = vsub.f32 %v2258_v12, %v334_v24  ;;  %v377_v5 = vsub.f32 %v2261_v13, %v334_v24  ;;  %v337_v30 = vpop.xlane.xlu1 %336 }
 0x106   : > { %1720 = vpow2.f32 %v406_v16  ;;  %v378_v6 = vsub.f32 %v2264_v14, %v337_v30  ;;  %v379_v8 = vsub.f32 %v2267_v15, %v337_v30 }
 0x107   : > { %1722 = vpow2.f32 %v412_v4  ;;  %v416_v9 = vmul.f32 1.442695, %v376_v27  ;;  %v418_v33 = vmul.f32 1.442695, %v377_v5 }
 0x108   : > { %1724 = vpow2.f32 %v414_v17  ;;  %v420_v36 = vmul.f32 1.442695, %v378_v6  ;;  %v422_v39 = vmul.f32 1.442695, %v379_v8  ;;  %v340_v42 = vpop.xlane.xlu0 %339 }
 0x109   : > { %1726 = vpow2.f32 %v416_v9  ;;  %v380_v45 = vsub.f32 %v2274_v18, %v340_v42  ;;  %v381_v12 = vsub.f32 %v2277_v19, %v340_v42  ;;  %v343_v46 = vpop.xlane.xlu1 %342 }
 0x10a   : > { %1728 = vpow2.f32 %v418_v33  ;;  %v382_v13 = vsub.f32 %v2280_v20, %v343_v46  ;;  %v383_v14 = vsub.f32 %v2283_v21, %v343_v46 }
 0x10b   : > { %v2369_v47 = vpop.eup %1710  ;;  %1730 = vpow2.f32 %v420_v36  ;;  %v424_v15 = vmul.f32 1.442695, %v380_v45  ;;  %v426_v48 = vmul.f32 1.442695, %v381_v12 }
 0x10c   : > { %v2371_v49 = vpop.eup %1712  ;;  %1732 = vpow2.f32 %v422_v39  ;;  %v428_v50 = vmul.f32 1.442695, %v382_v13  ;;  %v430_v51 = vmul.f32 1.442695, %v383_v14  ;;  %v346_v52 = vpop.xlane.xlu0 %345 }
 0x10d   : > { %v2373_v18 = vpop.eup %1714  ;;  %1734 = vpow2.f32 %v424_v15  ;;  %v384_v19 = vsub.f32 %v2286_v22, %v346_v52  ;;  %v385_v20 = vsub.f32 %v2289_v23, %v346_v52  ;;  %v464_v21 = vadd.f32 %v2371_v49, %v2369_v47  ;;  %v349_v53 = vpop.xlane.xlu1 %348 }
 0x10e   : > { %v2379_v54 = vpop.eup %1716  ;;  %1736 = vpow2.f32 %v426_v48  ;;  %v386_v55 = vsub.f32 %v2294_v25, %v349_v53  ;;  %v387_v56 = vsub.f32 %v2297_v26, %v349_v53 }
 0x10f   : > { %v2383_v57 = vpop.eup %1718  ;;  %1738 = vpow2.f32 %v428_v50  ;;  %v432_v58 = vmul.f32 1.442695, %v384_v19  ;;  %v434_v59 = vmul.f32 1.442695, %v385_v20  ;;  %465 = vadd.xlane.f32.xlu0 %v464_v21  ;;  %v470_v22 = vadd.f32 %v2379_v54, %v2373_v18 }
 0x110   : > { %v2387_v23 = vpop.eup %1720  ;;  %1740 = vpow2.f32 %v430_v51  ;;  %v436_v60 = vmul.f32 1.442695, %v386_v55  ;;  %v438_v61 = vmul.f32 1.442695, %v387_v56  ;;  %v352_v62 = vpop.xlane.xlu0 %351  ;;  %v1693_v55 = vld [vmem:[#allocation5 + $0x18] sm:$0xff]  }
 0x111   : > { %v2389_v63 = vpop.eup %1722  ;;  %1742 = vpow2.f32 %v432_v58  ;;  %v388_v25 = vsub.f32 %v2302_v28, %v352_v62  ;;  %v389_v26 = vsub.f32 %v2305_v29, %v352_v62  ;;  %v467_v3 = vadd.f32 %v2387_v23, %v2383_v57  ;;  %v355_v7 = vpop.xlane.xlu1 %354 }
 0x112   : > { %v2395_v10 = vpop.eup %1724  ;;  %1744 = vpow2.f32 %v434_v59  ;;  %v390_v11 = vsub.f32 %v2310_v31, %v355_v7  ;;  %v391_v0 = vsub.f32 %v2313_v32, %v355_v7 }
 0x113   : > { %v2399_v1 = vpop.eup %1726  ;;  %1746 = vpow2.f32 %v436_v60  ;;  %v440_v2 = vmul.f32 1.442695, %v388_v25  ;;  %v442_v16 = vmul.f32 1.442695, %v389_v26  ;;  %471 = vadd.xlane.f32.xlu0 %v470_v22  ;;  %468 = vadd.xlane.f32.xlu1 %v467_v3  ;;  %v473_v28 = vadd.f32 %v2395_v10, %v2389_v63  ;;  %v1694_v60 = vld [vmem:[#allocation5 + $0x60] sm:$0xff]  }
 0x114   : > { %v2403_v29 = vpop.eup %1728  ;;  %1748 = vpow2.f32 %v438_v61  ;;  %v444_v4 = vmul.f32 1.442695, %v390_v11  ;;  %v446_v17 = vmul.f32 1.442695, %v391_v0  ;;  %v358_v24 = vpop.xlane.xlu0 %357  ;;  %v1695_v25 = vld [vmem:[#allocation5 + $0x20] sm:$0xff]   ;;  %v1696_v0 = vld [vmem:[#allocation5 + $0x68] sm:$0xff]  }
 0x115   : > { %v2405_v27 = vpop.eup %1730  ;;  %1750 = vpow2.f32 %v440_v2  ;;  %v392_v31 = vsub.f32 %v2318_v34, %v358_v24  ;;  %v393_v32 = vsub.f32 %v2321_v35, %v358_v24  ;;  %v476_v5 = vadd.f32 %v2403_v29, %v2399_v1  ;;  %v361_v30 = vpop.xlane.xlu1 %360 }
 0x116   : > { %v2411_v6 = vpop.eup %1732  ;;  %1752 = vpow2.f32 %v442_v16  ;;  %v394_v8 = vsub.f32 %v2326_v37, %v361_v30  ;;  %v395_v9 = vsub.f32 %v2329_v38, %v361_v30 }
 0x117   : > { %v2415_v33 = vpop.eup %1734  ;;  %1754 = vpow2.f32 %v444_v4  ;;  %v448_v36 = vmul.f32 1.442695, %v392_v31  ;;  %v450_v39 = vmul.f32 1.442695, %v393_v32  ;;  %474 = vadd.xlane.f32.xlu1 %v473_v28  ;;  %477 = vadd.xlane.f32.xlu0 %v476_v5  ;;  %v479_v34 = vadd.f32 %v2411_v6, %v2405_v27  ;;  %v1697_v28 = vld [vmem:[#allocation5 + $0x28] sm:$0xff]   ;;  %v1698_v32 = vld [vmem:[#allocation5 + $0x70] sm:$0xff]  }
 0x118   : > { %v2419_v35 = vpop.eup %1736  ;;  %1756 = vpow2.f32 %v446_v17  ;;  %v452_v42 = vmul.f32 1.442695, %v394_v8  ;;  %v454_v45 = vmul.f32 1.442695, %v395_v9  ;;  %v364_v12 = vpop.xlane.xlu0 %363  ;;  %v1699_v8 = vld [vmem:[#allocation5 + $0x30] sm:$0xff]  }
 0x119   : > { %v2421_v46 = vpop.eup %1738  ;;  %1758 = vpow2.f32 %v448_v36  ;;  %v396_v37 = vsub.f32 %v2334_v40, %v364_v12  ;;  %v397_v38 = vsub.f32 %v2337_v41, %v364_v12  ;;  %v482_v13 = vadd.f32 %v2419_v35, %v2415_v33  ;;  %v367_v14 = vpop.xlane.xlu1 %366  ;;  %v1692_v41 = vld [vmem:[#allocation5 + $0x58] sm:$0xff]   ;;  %v1704_v12 = vld [vmem:[#allocation7 + $0x10] sm:$0xff]  }
 0x11a   : > { %v2427_v15 = vpop.eup %1740  ;;  %1760 = vpow2.f32 %v450_v39  ;;  %v398_v48 = vsub.f32 %v2342_v43, %v367_v14  ;;  %v399_v50 = vsub.f32 %v2345_v44, %v367_v14  ;;  %1500 = vmatprep.subr.bf16.mxu0 %v1692_v41  ;;  %v1700_v39 = vld [vmem:[#allocation5 + $0x78] sm:$0xff]  }
 0x11b   : > { %v2431_v51 = vpop.eup %1742  ;;  %1762 = vpow2.f32 %v452_v42  ;;  %v456_v52 = vmul.f32 1.442695, %v396_v37  ;;  %v458_v19 = vmul.f32 1.442695, %v397_v38  ;;  %480 = vadd.xlane.f32.xlu1 %v479_v34  ;;  %483 = vadd.xlane.f32.xlu0 %v482_v13  ;;  %v485_v40 = vadd.f32 %v2427_v15, %v2421_v46  ;;  %v1701_v34 = vld [vmem:[#allocation5 + $0x38] sm:$0xff]   ;;  %v1702_v42 = vld [vmem:[#allocation7] sm:$0xff]  }
 0x11c   : > { %v2435_v20 = vpop.eup %1744  ;;  %1764 = vpow2.f32 %v454_v45  ;;  %v460_v21 = vmul.f32 1.442695, %v398_v48  ;;  %v462_v53 = vmul.f32 1.442695, %v399_v50  ;;  %1501 = vmatpush3.bf16.msra.mxu0 %v1693_v55  ;;  %v1703_v45 = vld [vmem:[#allocation7 + $0x8] sm:$0xff]   ;;  %1574 = vmatprep.subr.bf16.mxu1 %v1702_v42 }
 0x11d   : > { %v2437_v43 = vpop.eup %1746  ;;  %1766 = vpow2.f32 %v456_v52  ;;  %v488_v44 = vadd.f32 %v2435_v20, %v2431_v51  ;;  %1502 = vmatprep.subr.bf16.mxu0 %v1694_v60  ;;  %1575 = vmatpush3.bf16.msra.mxu1 %v1702_v42 }
 0x11e   : > { %v2441_v56 = vpop.eup %1748  ;;  %1768 = vpow2.f32 %v458_v19  ;;  %1576 = vmatprep.subr.bf16.mxu1 %v1703_v45 }
 0x11f   : > { %v2443_v58 = vpop.eup %1750  ;;  %1770 = vpow2.f32 %v460_v21  ;;  %486 = vadd.xlane.f32.xlu1 %v485_v40  ;;  %489 = vadd.xlane.f32.xlu0 %v488_v44  ;;  %v491_v59 = vadd.f32 %v2441_v56, %v2437_v43 }
 0x120   : > { %v2447_v22 = vpop.eup %1752  ;;  %1772 = vpow2.f32 %v462_v53  ;;  %1503 = vmatpush3.bf16.msra.mxu0 %v1695_v25 }
 0x121   : > { %v2449_v61 = vpop.eup %1754  ;;  %v494_v62 = vadd.f32 %v2447_v22, %v2443_v58  ;;  %1504 = vmatprep.subr.bf16.mxu0 %v1696_v0  ;;  %1577 = vmatpush3.bf16.msra.mxu1 %v1703_v45 }
 0x122   : > { %v2453_v26 = vpop.eup %1756  ;;  %1578 = vmatprep.subr.bf16.mxu1 %v1704_v12 }
 0x123   : > { %v2455_v3 = vpop.eup %1758  ;;  %492 = vadd.xlane.f32.xlu1 %v491_v59  ;;  %495 = vadd.xlane.f32.xlu0 %v494_v62  ;;  %v497_v7 = vadd.f32 %v2453_v26, %v2449_v61 }
 0x124   : > { %v2459_v11 = vpop.eup %1760  ;;  %1505 = vmatpush3.bf16.msra.mxu0 %v1697_v28 }
 0x125   : > { %v2461_v2 = vpop.eup %1762  ;;  %v500_v16 = vadd.f32 %v2459_v11, %v2455_v3  ;;  %1506 = vmatprep.subr.bf16.mxu0 %v1698_v32  ;;  %1579 = vmatpush3.bf16.msra.mxu1 %v1704_v12 }
 0x126   : > { %v2465_v4 = vpop.eup %1764 }
 0x127   : > { %v2467_v17 = vpop.eup %1766  ;;  %498 = vadd.xlane.f32.xlu1 %v497_v7  ;;  %501 = vadd.xlane.f32.xlu0 %v500_v16  ;;  %v503_v24 = vadd.f32 %v2465_v4, %v2461_v2 }
 0x128   : > { %v2471_v31 = vpop.eup %1768  ;;  %1507 = vmatpush3.bf16.msra.mxu0 %v1699_v8 }
 0x129   : > { %v2473_v5 = vpop.eup %1770  ;;  %v506_v30 = vadd.f32 %v2471_v31, %v2467_v17  ;;  %1508 = vmatprep.subr.bf16.mxu0 %v1700_v39 }
 0x12a   : > { %v2477_v9 = vpop.eup %1772 }
 0x12b   : > { %504 = vadd.xlane.f32.xlu1 %v503_v24  ;;  %507 = vadd.xlane.f32.xlu0 %v506_v30  ;;  %v509_v36 = vadd.f32 %v2477_v9, %v2473_v5 }
 0x12c   : > { %1509 = vmatpush3.bf16.msra.mxu0 %v1701_v34 }
 0x12f   : > { %510 = vadd.xlane.f32.xlu1 %v509_v36 }
 0x19c   : > { %v466_v37 = vpop.xlane.xlu0 %465 }
 0x19d   : > { %1774 = vrcp.f32 %v466_v37 }
 0x1a0   : > { %v469_v38 = vpop.xlane.xlu1 %468  ;;  %v472_v13 = vpop.xlane.xlu0 %471 }
 0x1a1   : > { %1776 = vrcp.f32 %v469_v38 }
 0x1a2   : > { %1778 = vrcp.f32 %v472_v13 }
 0x1a4   : > { %v475_v14 = vpop.xlane.xlu1 %474  ;;  %v478_v48 = vpop.xlane.xlu0 %477 }
 0x1a5   : > { %1780 = vrcp.f32 %v475_v14 }
 0x1a6   : > { %1782 = vrcp.f32 %v478_v48 }
 0x1a7   : > { %v1775_v50 = vpop.eup %1774 }
 0x1a8   : > { %v481_v52 = vpop.xlane.xlu1 %480  ;;  %v484_v19 = vpop.xlane.xlu0 %483  ;;  %v528_v40 = vmul.f32 %v1775_v50, %v2369_v47  ;;  %v529_v41 = vmul.f32 %v1775_v50, %v2371_v49 }
 0x1a9   : > { %1784 = vrcp.f32 %v481_v52 }
 0x1aa   : > { %1786 = vrcp.f32 %v484_v19  ;;  %v1412_v21 = vpack.c.bf16 %v529_v41, %v528_v40 }
 0x1ab   : > { %v1777_v53 = vpop.eup %1776 }
 0x1ac   : > { %v1779_v55 = vpop.eup %1778  ;;  %v487_v44 = vpop.xlane.xlu1 %486  ;;  %v530_v60 = vmul.f32 %v1777_v53, %v2383_v57  ;;  %v531_v62 = vmul.f32 %v1777_v53, %v2387_v23  ;;  %656 = vst [vmem:[%s2486_s26] sm:$0xff] %v1412_v21 }
 0x1ad   : > { %v490_v59 = vpop.xlane.xlu0 %489  ;;  %1788 = vrcp.f32 %v487_v44  ;;  %v533_v47 = vmul.f32 %v1779_v55, %v2379_v54  ;;  %v532_v49 = vmul.f32 %v1779_v55, %v2373_v18 }
 0x1ae   : > { %1790 = vrcp.f32 %v490_v59  ;;  %v561_v25 = vpack.c.bf16 %v531_v62, %v529_v41  ;;  %v1413_v7 = vpack.c.bf16 %v531_v62, %v530_v60  ;;  %v560_v0 = vpack.c.bf16 %v530_v60, %v528_v40 }
 0x1af   : > { %v1781_v16 = vpop.eup %1780  ;;  %v1414_v28 = vpack.c.bf16 %v533_v47, %v532_v49 }
 0x1b0   : > { %v1783_v57 = vpop.eup %1782  ;;  %v493_v24 = vpop.xlane.xlu1 %492  ;;  %657 = vst [vmem:[%s2486_s26 + $0x8] sm:$0xff] %v1413_v7  ;;  %839 = vmatprep.mubr.bf16.mxu0 %v561_v25  ;;  %v535_v32 = vmul.f32 %v1781_v16, %v2395_v10  ;;  %v534_v30 = vmul.f32 %v1781_v16, %v2389_v63 }
 0x1b1   : > { %v496_v23 = vpop.xlane.xlu0 %495  ;;  %1792 = vrcp.f32 %v493_v24  ;;  %840 = vmatmul.mubr.bf16.vlgmr.msra.gmra.mrb[0].mxu0 %v560_v0  ;;  %658 = vst [vmem:[%s2486_s26 + $0x10] sm:$0xff] %v1414_v28  ;;  %v537_v18 = vmul.f32 %v1783_v57, %v2403_v29  ;;  %v536_v54 = vmul.f32 %v1783_v57, %v2399_v1 }
 0x1b2   : > { %1794 = vrcp.f32 %v496_v23  ;;  %v563_v8 = vpack.c.bf16 %v535_v32, %v533_v47  ;;  %v1415_v36 = vpack.c.bf16 %v535_v32, %v534_v30  ;;  %v562_v13 = vpack.c.bf16 %v534_v30, %v532_v49 }
 0x1b3   : > { %v1785_v39 = vpop.eup %1784  ;;  %v1416_v34 = vpack.c.bf16 %v537_v18, %v536_v54 }
 0x1b4   : > { %v1787_v42 = vpop.eup %1786  ;;  %v499_v45 = vpop.xlane.xlu1 %498  ;;  %847 = vmatprep.mubr.bf16.mxu0 %v563_v8  ;;  %659 = vst [vmem:[%s2486_s26 + $0x18] sm:$0xff] %v1415_v36  ;;  %v539_v63 = vmul.f32 %v1785_v39, %v2411_v6  ;;  %v538_v12 = vmul.f32 %v1785_v39, %v2405_v27  ;;  %v1706_v39 = vld [vmem:[#allocation7 + $0x20] sm:$0xff]  }
 0x1b5   : > { %v502_v10 = vpop.xlane.xlu0 %501  ;;  %1796 = vrcp.f32 %v499_v45  ;;  %660 = vst [vmem:[%s2486_s26 + $0x20] sm:$0xff] %v1416_v34  ;;  %v541_v29 = vmul.f32 %v1787_v42, %v2419_v35  ;;  %v2503_v1 = vmul.f32 %v1787_v42, %v2415_v33  ;;  %v1707_v34 = vld [vmem:[#allocation7 + $0x28] sm:$0xff]   ;;  %v1708_v42 = vld [vmem:[#allocation7 + $0x30] sm:$0xff]   ;;  %v1709_v45 = vld [vmem:[#allocation7 + $0x38] sm:$0xff]  }
 0x1b6   : > { %1798 = vrcp.f32 %v502_v10  ;;  %v1417_v37 = vpack.c.bf16 %v539_v63, %v538_v12  ;;  %v565_v6 = vpack.c.bf16 %v539_v63, %v537_v18  ;;  %v564_v60 = vpack.c.bf16 %v538_v12, %v536_v54  ;;  %v2539_v12 = vld [vmem:[%s2643_s2] ss:$0 sm:$0xff] }
 0x1b7   : > { %v1789_v38 = vpop.eup %1788  ;;  %v1418_v14 = vpack.c.bf16 %v541_v29, %v2503_v1 }
 0x1b8   : > { %v1791_v48 = vpop.eup %1790  ;;  %v505_v50 = vpop.xlane.xlu1 %504  ;;  %661 = vst [vmem:[%s2486_s26 + $0x28] sm:$0xff] %v1417_v37  ;;  %v543_v27 = vmul.f32 %v1789_v38, %v2427_v15  ;;  %v542_v35 = vmul.f32 %v1789_v38, %v2421_v46 }
 0x1b9   : > { %v508_v52 = vpop.xlane.xlu0 %507  ;;  %1800 = vrcp.f32 %v505_v50  ;;  %848 = vmatmul.mubr.bf16.gmra.mrb[4].mxu0 %v562_v13  ;;  %662 = vst [vmem:[%s2486_s26 + $0x30] sm:$0xff] %v1418_v14  ;;  %v545_v33 = vmul.f32 %v1791_v48, %v2435_v20  ;;  %v544_v19 = vmul.f32 %v1791_v48, %v2431_v51 }
 0x1ba   : > { %1802 = vrcp.f32 %v508_v52  ;;  %855 = vmatprep.mubr.bf16.mxu0 %v565_v6  ;;  %v1419_v40 = vpack.c.bf16 %v543_v27, %v542_v35  ;;  %v567_v49 = vpack.c.bf16 %v543_v27, %v541_v29  ;;  %v566_v24 = vpack.c.bf16 %v542_v35, %v2503_v1 }
 0x1bb   : > { %v1793_v41 = vpop.eup %1792  ;;  %v1420_v21 = vpack.c.bf16 %v545_v33, %v544_v19 }
 0x1bc   : > { %v1795_v53 = vpop.eup %1794  ;;  %v511_v55 = vpop.xlane.xlu1 %510  ;;  %663 = vst [vmem:[%s2486_s26 + $0x38] sm:$0xff] %v1419_v40  ;;  %v547_v15 = vmul.f32 %v1793_v41, %v2441_v56  ;;  %v546_v46 = vmul.f32 %v1793_v41, %v2437_v43 }
 0x1bd   : > { %1804 = vrcp.f32 %v511_v55  ;;  %664 = vst [vmem:[%s2486_s26 + $0x40] sm:$0xff] %v1420_v21  ;;  %v549_v20 = vmul.f32 %v1795_v53, %v2447_v22  ;;  %v548_v51 = vmul.f32 %v1795_v53, %v2443_v58 }
 0x1be   : > { %v1421_v44 = vpack.c.bf16 %v547_v15, %v546_v46  ;;  %v569_v32 = vpack.c.bf16 %v547_v15, %v545_v33 }
 0x1bf   : > { %v1797_v59 = vpop.eup %1796  ;;  %v1422_v62 = vpack.c.bf16 %v549_v20, %v548_v51 }
 0x1c0   : > { %v1799_v47 = vpop.eup %1798  ;;  %665 = vst [vmem:[%s2486_s26 + $0x48] sm:$0xff] %v1421_v44  ;;  %v551_v56 = vmul.f32 %v1797_v59, %v2453_v26  ;;  %v550_v25 = vmul.f32 %v1797_v59, %v2449_v61 }
 0x1c1   : > { %856 = vmatmul.mubr.bf16.gmra.mrb[8].mxu0 %v564_v60  ;;  %666 = vst [vmem:[%s2486_s26 + $0x50] sm:$0xff] %v1422_v62  ;;  %v553_v43 = vmul.f32 %v1799_v47, %v2459_v11  ;;  %v552_v22 = vmul.f32 %v1799_v47, %v2455_v3 }
 0x1c2   : > { %863 = vmatprep.mubr.bf16.mxu0 %v567_v49  ;;  %v1423_v58 = vpack.c.bf16 %v551_v56, %v550_v25 }
 0x1c3   : > { %v1801_v7 = vpop.eup %1800  ;;  %v1424_v0 = vpack.c.bf16 %v553_v43, %v552_v22 }
 0x1c4   : > { %v1803_v16 = vpop.eup %1802  ;;  %667 = vst [vmem:[%s2486_s26 + $0x58] sm:$0xff] %v1423_v58  ;;  %v555_v28 = vmul.f32 %v1801_v7, %v2465_v4  ;;  %v554_v26 = vmul.f32 %v1801_v7, %v2461_v2  ;;  %v568_v4 = vpack.c.bf16 %v546_v46, %v544_v19 }
 0x1c5   : > { %668 = vst [vmem:[%s2486_s26 + $0x60] sm:$0xff] %v1424_v0  ;;  %v557_v61 = vmul.f32 %v1803_v16, %v2471_v31  ;;  %v556_v11 = vmul.f32 %v1803_v16, %v2467_v17  ;;  %v571_v31 = vpack.c.bf16 %v551_v56, %v549_v20  ;;  %v570_v17 = vpack.c.bf16 %v550_v25, %v548_v51 }
 0x1c6   : > { %v1425_v57 = vpack.c.bf16 %v555_v28, %v554_v26  ;;  %v573_v54 = vpack.c.bf16 %v555_v28, %v553_v43  ;;  %v572_v8 = vpack.c.bf16 %v554_v26, %v552_v22 }
 0x1c7   : > { %v1805_v3 = vpop.eup %1804  ;;  %v1426_v23 = vpack.c.bf16 %v557_v61, %v556_v11 }
 0x1c8   : > { %669 = vst [vmem:[%s2486_s26 + $0x68] sm:$0xff] %v1425_v57  ;;  %v559_v30 = vmul.f32 %v1805_v3, %v2477_v9  ;;  %v558_v18 = vmul.f32 %v1805_v3, %v2473_v5  ;;  %v1705_v5 = vld [vmem:[#allocation7 + $0x18] sm:$0xff]  }
 0x1c9   : > { %864 = vmatmul.mubr.bf16.gmra.mrb[12].mxu0 %v566_v24  ;;  %670 = vst [vmem:[%s2486_s26 + $0x70] sm:$0xff] %v1426_v23  ;;  %1580 = vmatprep.subr.bf16.mxu1 %v1705_v5 }
 0x1ca   : > { %871 = vmatprep.mubr.bf16.mxu0 %v569_v32  ;;  %v1427_v2 = vpack.c.bf16 %v559_v30, %v558_v18  ;;  %v575_v36 = vpack.c.bf16 %v559_v30, %v557_v61  ;;  %v574_v9 = vpack.c.bf16 %v558_v18, %v556_v11  ;;  %1581 = vmatpush3.bf16.msra.mxu1 %v1705_v5 }
 0x1cb   : > { %1582 = vmatprep.subr.bf16.mxu1 %v1706_v39 }
 0x1cc   : > { %671 = vst [vmem:[%s2486_s26 + $0x78] sm:$0xff] %v1427_v2 }
 0x1ce   : > { %1583 = vmatpush3.bf16.msra.mxu1 %v1706_v39 }
 0x1cf   : > { %1584 = vmatprep.subr.bf16.mxu1 %v1707_v34 }
 0x1d1   : > { %872 = vmatmul.mubr.bf16.gmra.mrb[16].mxu0 %v568_v4 }
 0x1d2   : > { %879 = vmatprep.mubr.bf16.mxu0 %v571_v31  ;;  %1585 = vmatpush3.bf16.msra.mxu1 %v1707_v34 }
 0x1d3   : > { %1586 = vmatprep.subr.bf16.mxu1 %v1708_v42 }
 0x1d6   : > { %1587 = vmatpush3.bf16.msra.mxu1 %v1708_v42 }
 0x1d7   : > { %1588 = vmatprep.subr.bf16.mxu1 %v1709_v45 }
 0x1d9   : > { %880 = vmatmul.mubr.bf16.gmra.mrb[20].mxu0 %v570_v17 }
 0x1da   : > { %887 = vmatprep.mubr.bf16.mxu0 %v573_v54  ;;  %1589 = vmatpush3.bf16.msra.mxu1 %v1709_v45 }
 0x1e1   : > { %888 = vmatmul.mubr.bf16.gmra.mrb[24].mxu0 %v572_v8 }
 0x1e2   : > { %895 = vmatprep.mubr.bf16.mxu0 %v575_v36 }
 0x1e9   : > { %896 = vmatmul.mubr.bf16.gmra.mrb[28].mxu0 %v574_v9 }
 0x284   : > { %v1510_v10 = vpop.f32.mrb[0].mxu0 }
 0x285   : > { %v1511_v63 = vpop.f32.mrb[1].mxu0 }
 0x286   : > { %v1512_v29 = vadd.f32 %v1511_v63, %v1510_v10  ;;  %v1513_v1 = vpop.f32.mrb[2].mxu0 }
 0x287   : > { %v1514_v37 = vpop.f32.mrb[3].mxu0 }
 0x288   : > { %v1515_v38 = vadd.f32 %v1514_v37, %v1513_v1  ;;  %v842_v13 = vadd.f32 %v1512_v29, %v2539_v12 }
 0x28a   : > { %v845_v14 = vadd.f32 %v1515_v38, %v2539_v12  ;;  %v904_v50 = vmax.f32 %v842_v13, 0.0 }
 0x28c   : > { %v1516_v48 = vpop.f32.mrb[4].mxu0  ;;  %v905_v52 = vmax.f32 %v845_v14, 0.0 }
 0x28d   : > { %v1517_v6 = vpop.f32.mrb[5].mxu0 }
 0x28e   : > { %v1518_v27 = vadd.f32 %v1517_v6, %v1516_v48  ;;  %v1519_v35 = vpop.f32.mrb[6].mxu0  ;;  %v920_v33 = vpack.c.bf16 %v905_v52, %v904_v50 }
 0x28f   : > { %v1520_v19 = vpop.f32.mrb[7].mxu0 }
 0x290   : > { %v850_v40 = vadd.f32 %v1518_v27, %v2539_v12  ;;  %v1521_v41 = vadd.f32 %v1520_v19, %v1519_v35  ;;  %1590 = vmatprep.mubr.bf16.mxu1 %v920_v33 }
 0x292   : > { %v853_v21 = vadd.f32 %v1521_v41, %v2539_v12  ;;  %v906_v53 = vmax.f32 %v850_v40, 0.0 }
 0x294   : > { %v907_v55 = vmax.f32 %v853_v21, 0.0  ;;  %v1522_v15 = vpop.f32.mrb[8].mxu0 }
 0x295   : > { %v1523_v46 = vpop.f32.mrb[9].mxu0 }
 0x296   : > { %v1524_v20 = vadd.f32 %v1523_v46, %v1522_v15  ;;  %v1525_v51 = vpop.f32.mrb[10].mxu0  ;;  %v921_v44 = vpack.c.bf16 %v907_v55, %v906_v53 }
 0x297   : > { %v1526_v59 = vpop.f32.mrb[11].mxu0 }
 0x298   : > { %v858_v60 = vadd.f32 %v1524_v20, %v2539_v12  ;;  %v1527_v62 = vadd.f32 %v1526_v59, %v1525_v51  ;;  %1591 = vmatmul.mubr.bf16.vlgmr.msra.gmra.mrb[0].mxu1 %v921_v44 }
 0x29a   : > { %v861_v47 = vadd.f32 %v1527_v62, %v2539_v12  ;;  %v908_v49 = vmax.f32 %v858_v60, 0.0 }
 0x29c   : > { %v909_v56 = vmax.f32 %v861_v47, 0.0  ;;  %v1528_v25 = vpop.f32.mrb[12].mxu0 }
 0x29d   : > { %v1529_v43 = vpop.f32.mrb[13].mxu0 }
 0x29e   : > { %v1530_v22 = vadd.f32 %v1529_v43, %v1528_v25  ;;  %v1531_v58 = vpop.f32.mrb[14].mxu0  ;;  %v922_v7 = vpack.c.bf16 %v909_v56, %v908_v49 }
 0x29f   : > { %v1532_v0 = vpop.f32.mrb[15].mxu0 }
 0x2a0   : > { %v866_v16 = vadd.f32 %v1530_v22, %v2539_v12  ;;  %v1533_v28 = vadd.f32 %v1532_v0, %v1531_v58  ;;  %1594 = vmatprep.mubr.bf16.mxu1 %v922_v7 }
 0x2a2   : > { %v869_v26 = vadd.f32 %v1533_v28, %v2539_v12  ;;  %v910_v61 = vmax.f32 %v866_v16, 0.0 }
 0x2a4   : > { %v911_v11 = vmax.f32 %v869_v26, 0.0  ;;  %v1534_v57 = vpop.f32.mrb[16].mxu0 }
 0x2a5   : > { %v1535_v3 = vpop.f32.mrb[17].mxu0 }
 0x2a6   : > { %v1536_v24 = vadd.f32 %v1535_v3, %v1534_v57  ;;  %v1537_v23 = vpop.f32.mrb[18].mxu0  ;;  %v923_v32 = vpack.c.bf16 %v911_v11, %v910_v61 }
 0x2a7   : > { %v1538_v30 = vpop.f32.mrb[19].mxu0 }
 0x2a8   : > { %v874_v18 = vadd.f32 %v1536_v24, %v2539_v12  ;;  %v1539_v2 = vadd.f32 %v1538_v30, %v1537_v23  ;;  %1595 = vmatmul.mubr.bf16.gmra.mrb[4].mxu1 %v923_v32 }
 0x2aa   : > { %v877_v4 = vadd.f32 %v1539_v2, %v2539_v12  ;;  %v912_v31 = vmax.f32 %v874_v18, 0.0 }
 0x2ac   : > { %v913_v17 = vmax.f32 %v877_v4, 0.0  ;;  %v1540_v54 = vpop.f32.mrb[20].mxu0 }
 0x2ad   : > { %v1541_v8 = vpop.f32.mrb[21].mxu0 }
 0x2ae   : > { %v1542_v36 = vadd.f32 %v1541_v8, %v1540_v54  ;;  %v1543_v9 = vpop.f32.mrb[22].mxu0  ;;  %v924_v5 = vpack.c.bf16 %v913_v17, %v912_v31 }
 0x2af   : > { %v1544_v39 = vpop.f32.mrb[23].mxu0 }
 0x2b0   : > { %v882_v34 = vadd.f32 %v1542_v36, %v2539_v12  ;;  %v1545_v42 = vadd.f32 %v1544_v39, %v1543_v9  ;;  %1598 = vmatprep.mubr.bf16.mxu1 %v924_v5 }
 0x2b2   : > { %v885_v45 = vadd.f32 %v1545_v42, %v2539_v12  ;;  %v914_v10 = vmax.f32 %v882_v34, 0.0 }
 0x2b4   : > { %v915_v63 = vmax.f32 %v885_v45, 0.0  ;;  %v1546_v29 = vpop.f32.mrb[24].mxu0 }
 0x2b5   : > { %v1547_v1 = vpop.f32.mrb[25].mxu0 }
 0x2b6   : > { %v1548_v37 = vadd.f32 %v1547_v1, %v1546_v29  ;;  %v1549_v38 = vpop.f32.mrb[26].mxu0  ;;  %v925_v13 = vpack.c.bf16 %v915_v63, %v914_v10 }
 0x2b7   : > { %v1550_v14 = vpop.f32.mrb[27].mxu0 }
 0x2b8   : > { %v890_v48 = vadd.f32 %v1548_v37, %v2539_v12  ;;  %v1551_v50 = vadd.f32 %v1550_v14, %v1549_v38  ;;  %1599 = vmatmul.mubr.bf16.gmra.mrb[8].mxu1 %v925_v13 }
 0x2ba   : > { %v893_v52 = vadd.f32 %v1551_v50, %v2539_v12  ;;  %v916_v6 = vmax.f32 %v890_v48, 0.0 }
 0x2bc   : > { %v917_v27 = vmax.f32 %v893_v52, 0.0  ;;  %v1552_v35 = vpop.f32.mrb[28].mxu0 }
 0x2bd   : > { %v1553_v33 = vpop.f32.mrb[29].mxu0 }
 0x2be   : > { %v1554_v19 = vadd.f32 %v1553_v33, %v1552_v35  ;;  %v1555_v40 = vpop.f32.mrb[30].mxu0  ;;  %v926_v41 = vpack.c.bf16 %v917_v27, %v916_v6 }
 0x2bf   : > { %v1556_v21 = vpop.f32.mrb[31].mxu0 }
 0x2c0   : > { %v898_v53 = vadd.f32 %v1554_v19, %v2539_v12  ;;  %v1557_v55 = vadd.f32 %v1556_v21, %v1555_v40  ;;  %1602 = vmatprep.mubr.bf16.mxu1 %v926_v41 }
 0x2c2   : > { %v901_v15 = vadd.f32 %v1557_v55, %v2539_v12  ;;  %v918_v46 = vmax.f32 %v898_v53, 0.0 }
 0x2c4   : > { %v919_v20 = vmax.f32 %v901_v15, 0.0 }
 0x2c6   : > { %v927_v51 = vpack.c.bf16 %v919_v20, %v918_v46 }
 0x2c8   : > { %1603 = vmatmul.mubr.bf16.gmra.mrb[12].mxu1 %v927_v51 }
 0x2c9   : > { %1905 = shalt.err (!%p1902_p2)
}
 0x2ca   : > { %s1906_s6 = scalar_lea.hbm %s2562_s16, 2048  ;;  %s1910_s8 = scalar_lea.hbm %s2646_s5, 4096 }
 0x2cb   : > { %p1907_p13 = scmp.ne.s32.totalorder %s2562_s16, %s1906_s6  ;;  %p1911_p4 = scmp.lt.u32.totalorder %s2562_s16, %s2646_s5 }
 0x2cc   : > { %p1912_p5 = scmp.lt.u32.totalorder %s1910_s8, %s1906_s6  ;;  %p1914_p11 = scmp.lt.u32.totalorder %s1906_s6, %s2562_s16 }
 0x2cd   : > { %p1908_p6 = pnand %p1907_p13, %p2660_p0 }
 0x2ce   : > { %p1913_p8 = por %p1912_p5, %p1911_p4 }
 0x2cf   : > { %p1909_p10 = pneg %p1908_p6 }
 0x2d0   : > { %p1915_p1 = por %p1914_p11, %p1913_p8 }
 0x2d2   : > { %p1916_p3 = pnand %p1915_p1, %p1909_p10 }
 0x2d4   : > { %1919 = shalt.err (!%p1916_p3)
}
 0x2d5   : > { %s2004_s30 = smov 128   ;;  %s2005_s15 = smov 8  }
 0x2d6   : > { %1617 = dma.vmem_to_hbm [thread:$0]  (%p2660_p0), %s2564_s28, 2048, %s2562_s16, %s1175_s9, %s2004_s30, %s2004_s30, %s2005_s15  }
 0x2d7   : > { %s1342_s12 = sshll.u32 %s2211_s29, 6  ;;  %s1444_s16 = sshll.u32 %s2060_s22, 10 }
 0x2d8   : > { %s276_s13 = scalar_lea.vmem [#allocation8], %s1342_s12  ;;  %s2597_s7 = scalar_lea.hbm %s2645_s4, %s1444_s16 }
 0x2d9   : > { %s1188_s28 = sshll.u32 %s276_s13, 4  ;;  %s1170_s6 = scalar_lea.sflag [#allocation4], %s2211_s29  ;;  %s2592_s28 = int_to_ptr.vmem [resolvable:$true] %s1188_s28 }
 0x2da   : > { %s1920_s24 = scalar_lea.vmem %s2592_s28, 1024  ;;  %s2006_s22 = smov [#allocation8]  }
 0x2db   : > { %p1921_p7 = scmp.ne.s32.totalorder %s2592_s28, %s1920_s24  ;;  %s1924_s26 = sshll.u32 %s2006_s22, 4  ;;  %s1925_s26 = int_to_ptr.vmem [resolvable:$false] %s1924_s26 }
 0x2dc   : > { %s1926_s8 = scalar_lea.vmem %s1925_s26, 2048  ;;  %p1927_p2 = scmp.lt.s32.totalorder %s2592_s28, %s1925_s26 }
 0x2dd   : > { %p1922_p9 = pnand %p1921_p7, %p2660_p0  ;;  %p1928_p13 = scmp.lt.s32.totalorder %s1926_s8, %s1920_s24 }
 0x2df   : > { %p1923_p12 = pneg %p1922_p9  ;;  %p1929_p6 = por %p1928_p13, %p1927_p2 }
 0x2e1   : > { %p1930_p10 = pnand %p1929_p6, %p1923_p12 }
 0x36b   : > { %v1592_v12 = vpop.f32.mrb[0].mxu1 }
 0x36c   : > { %v1026_v44 = vpop.f32.mrb[1].mxu1 }
 0x36d   : > { %v1593_v59 = vpop.f32.mrb[2].mxu1 }
 0x36e   : > { %v1455_v60 = vpack.c.bf16 %v1593_v59, %v1592_v12  ;;  %v1029_v62 = vpop.f32.mrb[3].mxu1 }
 0x36f   : > { %v1450_v47 = vpack.c.bf16 %v1029_v62, %v1026_v44 }
 0x370   : > { %1487 = vst [vmem:[%s276_s13 + $0x8] sm:$0xff] %v1455_v60  }
 0x371   : > { %1451 = vst [vmem:[%s276_s13] sm:$0xff] %v1450_v47  }
 0x37b   : > { %v1596_v49 = vpop.f32.mrb[4].mxu1 }
 0x37c   : > { %v1042_v56 = vpop.f32.mrb[5].mxu1 }
 0x37d   : > { %v1597_v25 = vpop.f32.mrb[6].mxu1 }
 0x37e   : > { %v1465_v43 = vpack.c.bf16 %v1597_v25, %v1596_v49  ;;  %v1045_v22 = vpop.f32.mrb[7].mxu1 }
 0x37f   : > { %v1460_v58 = vpack.c.bf16 %v1045_v22, %v1042_v56 }
 0x380   : > { %1489 = vst [vmem:[%s276_s13 + $0x18] sm:$0xff] %v1465_v43  }
 0x381   : > { %1488 = vst [vmem:[%s276_s13 + $0x10] sm:$0xff] %v1460_v58  }
 0x38b   : > { %v1600_v7 = vpop.f32.mrb[8].mxu1 }
 0x38c   : > { %v1058_v0 = vpop.f32.mrb[9].mxu1 }
 0x38d   : > { %v1601_v16 = vpop.f32.mrb[10].mxu1 }
 0x38e   : > { %v1475_v28 = vpack.c.bf16 %v1601_v16, %v1600_v7  ;;  %v1061_v26 = vpop.f32.mrb[11].mxu1 }
 0x38f   : > { %v1470_v61 = vpack.c.bf16 %v1061_v26, %v1058_v0 }
 0x390   : > { %1491 = vst [vmem:[%s276_s13 + $0x28] sm:$0xff] %v1475_v28  }
 0x391   : > { %1490 = vst [vmem:[%s276_s13 + $0x20] sm:$0xff] %v1470_v61  }
 0x39b   : > { %v1604_v11 = vpop.f32.mrb[12].mxu1 }
 0x39c   : > { %v1074_v57 = vpop.f32.mrb[13].mxu1 }
 0x39d   : > { %v1605_v3 = vpop.f32.mrb[14].mxu1 }
 0x39e   : > { %v1485_v24 = vpack.c.bf16 %v1605_v3, %v1604_v11  ;;  %v1077_v23 = vpop.f32.mrb[15].mxu1 }
 0x39f   : > { %v1480_v32 = vpack.c.bf16 %v1077_v23, %v1074_v57 }
 0x3a0   : > { %1493 = vst [vmem:[%s276_s13 + $0x38] sm:$0xff] %v1485_v24  }
 0x3a1   : > { %1492 = vst [vmem:[%s276_s13 + $0x30] sm:$0xff] %v1480_v32  }
 0x3a2   : > { %1933 = shalt.err (!%p1930_p10)
}
 0x3a3   : > { %s1934_s10 = scalar_lea.hbm %s2597_s7, 1024  ;;  %s1938_s15 = scalar_lea.hbm %s2645_s4, 2048 }
 0x3a4   : > { %p1935_p4 = scmp.ne.s32.totalorder %s2597_s7, %s1934_s10  ;;  %p1939_p11 = scmp.lt.u32.totalorder %s2597_s7, %s2645_s4 }
 0x3a5   : > { %p1940_p1 = scmp.lt.u32.totalorder %s1938_s15, %s1934_s10  ;;  %p1942_p7 = scmp.lt.u32.totalorder %s1934_s10, %s2597_s7 }
 0x3a6   : > { %p1936_p5 = pnand %p1935_p4, %p2660_p0 }
 0x3a7   : > { %p1941_p3 = por %p1940_p1, %p1939_p11 }
 0x3a8   : > { %p1937_p8 = pneg %p1936_p5 }
 0x3a9   : > { %p1943_p9 = por %p1942_p7, %p1941_p3 }
 0x3ab   : > { %p1944_p12 = pnand %p1943_p9, %p1937_p8 }
 0x3ad   : > { %1947 = shalt.err (!%p1944_p12)
}
 0x3ae   : > { %s2007_s16 = smov 64   ;;  %s2008_s9 = smov 4  }
 0x3af   : > { %1616 = dma.vmem_to_hbm [thread:$0]  (%p2660_p0), %s2592_s28, 1024, %s2597_s7, %s1170_s6, %s2007_s16, %s2007_s16, %s2008_s9  }
 0x3b0 PF: > { %s1220_s17 = sand.u32 1, %s1982_s18   ;;  %p2661_p2 = scmp.ne.s32.totalorder %s2651_s25, 0 }
 0x3b1   : > { %p2662_p13 = scmp.ge.s32.totalorder %s1994_s21, 2  ;;  %s1221_s24 = scalar_lea.sflag [#allocation4], %s1220_s17 }
 0x3b3   : > { %p1632_p6 = pnand %p2662_p13, %p2661_p2 }
 0x3b5   : > { %1973 = dma.done.wait (!%p1632_p6), %s1221_s24, 1024  }
 0x3b6   : > { %1975 = vsyncadd (!%p1632_p6), %s1221_s24, 4294966272  ;;  %s1230_s22 = scalar_lea.sflag [#allocation10], %s1220_s17 }
 0x3b7   : > { %1977 = dma.done.wait (!%p1632_p6), %s1230_s22, 2048  }
 0x3b8   : > { %1979 = vsyncadd (!%p1632_p6), %s1230_s22, 4294965248  ;;  %p23_p0 = scmp.ge.s32.totalorder %s2149_s14, 4   ;;  %s2663_s18 = smov %s1986_s19 }
 0x3b9   : > { %s2664_s19 = smov %s1990_s20  ;;  %s2665_s20 = smov %s2165_s27 }
 0x3ba   : > { %s2666_s21 = smov %s2149_s14  ;;  %25 = sbr.rel (!%p23_p0) target bundleno = 8 (0x8), region = 106 }
 0x3c1   :  { %1235 = vsyncpa [#allocation3], 1 }
 0x3c2   :  { %1237 = vsyncpa [#allocation3 + $0x1], 1 }
 0x3c3   :  { %1238 = vsyncpa [#allocation6], 1 }
 0x3c4   :  { %1239 = vsyncpa [#allocation4], 1 }
 0x3c5   :  { %1241 = vsyncpa [#allocation4 + $0x1], 1 }
 0x3c6   :  { %1242 = vsyncpa [#allocation10], 1 }
 0x3c7   :  { %1244 = vsyncpa [#allocation10 + $0x1], 1 }

</bundles_post_ra>
